<compile_context>
chip_gen: v7x
topology: tpu7x:2x2x1
jax: 0.10.0
libtpu: 0.0.40
codegen_flags: <defaults>
</compile_context>

<pallas_src>
import jax
import jax.numpy as jnp
from jax.experimental import pallas as pl
from jax.experimental.pallas import tpu as pltpu


# --------------------------------- kernel ---------------------------------

def _make_input_block_kernel(H, W, Cin, Cmid, NB):
    HW = H * W
    # 3x3 taps, kh-major; lane shift of tap (dh, dw) over the flattened H*W axis.
    shifts = [(kh - 1) * W + (kw - 1) for kh in range(3) for kw in range(3)]

    def kernel(x_ref, w1_ref, b1m_ref, w2_ref, b2m_ref, mask_ref, o_ref, stk2_ref):
        # x_ref:    (NB, Cin, HW)  f32   block of images, channels on sublanes
        # w1_ref:   (Cmid, 9*Cin)  bf16  conv1 (branches + bn1 + bn2 folded in)
        # b1m_ref:  (Cmid, HW)     f32   border-aware conv1 bias map (bn1 shift fold)
        # w2_ref:   (Cmid, 9*Cmid) bf16  conv2
        # b2m_ref:  (Cmid, HW)     f32   conv2 bias, lane pre-broadcast
        # mask_ref: (9, Cmid, HW)  f32   per-tap validity masks, pre-broadcast
        # stk2_ref: (9*Cmid, HW)   bf16  VMEM scratch: stacked conv2 taps
        for n in range(NB):                         # static, small image loop
            x = x_ref[n]                            # (Cin, HW) f32

            # ---- conv1: stack 9 masked lane-rolled taps along K, ONE dot.
            taps1 = []
            for t, d in enumerate(shifts):
                if d == 0:
                    taps1.append(x)                 # center tap: mask == 1
                else:
                    r = pltpu.roll(x, shift=(-d) % HW, axis=1)
                    taps1.append(r * mask_ref[t, :Cin, :])
            stack1 = jnp.concatenate(taps1, axis=0).astype(jnp.bfloat16)   # (9*Cin, HW)
            y = jnp.dot(w1_ref[...], stack1,
                        preferred_element_type=jnp.float32) + b1m_ref[...]  # (Cmid, HW)

            # ---- conv2: stack taps of y into VMEM scratch (aligned row blocks),
            #      then ONE K = 9*Cmid dot + bias + relu.
            for t, d in enumerate(shifts):
                if d == 0:
                    tap = y
                else:
                    tap = pltpu.roll(y, shift=(-d) % HW, axis=1) * mask_ref[t]
                stk2_ref[pl.ds(t * Cmid, Cmid), :] = tap.astype(jnp.bfloat16)
            z = jnp.dot(w2_ref[...], stk2_ref[...],
                        preferred_element_type=jnp.float32) + b2m_ref[...]
            o_ref[n] = jnp.maximum(z, 0.0)          # lane-dense (Cmid, HW) store

    return kernel


def _pick_block_n(N, max_nb=8):
    """Images per grid step: NB divides N, NB <= max_nb, keep >= 2 grid steps."""
    nb = 1
    for cand in range(1, min(N, max_nb) + 1):
        if N % cand == 0 and N // cand >= 2:
            nb = cand
    return nb


def input_block_pallas(x_nchw, kparams):
    w1b, b1map, w2b, b2map, maskb = kparams
    N, Cin, H, W = x_nchw.shape
    Cmid = b1map.shape[0]
    HW = H * W
    NB = _pick_block_n(N)
    x_flat = x_nchw.reshape(N, Cin, HW)             # free reshape, NCHW native

    def const_spec(shape):
        nd = len(shape)
        return pl.BlockSpec(shape, lambda i, _nd=nd: (0,) * _nd)

    kernel = _make_input_block_kernel(H, W, Cin, Cmid, NB)
    out_flat = pl.pallas_call(
        kernel,
        out_shape=jax.ShapeDtypeStruct((N, Cmid, HW), jnp.float32),
        grid_spec=pltpu.PrefetchScalarGridSpec(
            num_scalar_prefetch=0,
            grid=(N // NB,),
            in_specs=[
                pl.BlockSpec((NB, Cin, HW), lambda i: (i, 0, 0)),
                const_spec(w1b.shape), const_spec(b1map.shape),
                const_spec(w2b.shape), const_spec(b2map.shape),
                const_spec(maskb.shape),
            ],
            out_specs=pl.BlockSpec((NB, Cmid, HW), lambda i: (i, 0, 0)),
            scratch_shapes=[pltpu.VMEM((9 * Cmid, HW), jnp.bfloat16)],
        ),
        compiler_params=pltpu.CompilerParams(
            dimension_semantics=("parallel",)),
    )(x_flat, w1b, b1map, w2b, b2map, maskb)
    return out_flat.reshape(N, Cmid, H, W)          # NCHW, like PyTorch


# ----------------------------- parameters & folding -----------------------------

def make_torch_like_params(cfg, key):
    """Deterministic synthetic params with the same structure as InputBlock."""
    cin = cfg[0]
    n_branch, in_chs, _offsets, out_chs = cfg[1]
    cmid = int(sum(out_chs))
    keys = iter(jax.random.split(key, 4 + 2 * n_branch + 4 + 2))

    def bn_params(c):
        return dict(
            gamma=1.0 + 0.1 * jax.random.normal(next(keys), (c,), jnp.float32),
            beta=0.1 * jax.random.normal(next(keys), (c,), jnp.float32),
            mean=0.1 * jax.random.normal(next(keys), (c,), jnp.float32),
            var=jax.nn.softplus(jax.random.normal(next(keys), (c,), jnp.float32)) + 0.5)

    p = {"bn1": bn_params(cin), "conv1s": []}
    for i in range(n_branch):
        w = 0.1 * jax.random.normal(next(keys), (out_chs[i], in_chs[i], 3, 3), jnp.float32)
        b = 0.1 * jax.random.normal(next(keys), (out_chs[i],), jnp.float32)
        p["conv1s"].append((w, b))
    p["bn2"] = bn_params(cmid)
    p["conv2"] = (0.05 * jax.random.normal(next(keys), (cmid, cmid, 3, 3), jnp.float32),
                  0.1 * jax.random.normal(next(keys), (cmid,), jnp.float32))
    return p


def fold_params_for_kernel(cfg, p, H, W, eps=1e-5):
    """Fold BN (eval) + branch fusion + bn1 into kernel-ready stacked-tap tensors."""
    cin = cfg[0]
    n_branch, in_chs, offsets, out_chs = cfg[1]
    cmid = int(sum(out_chs))
    HW = H * W

    s1 = p["bn1"]["gamma"] / jnp.sqrt(p["bn1"]["var"] + eps)
    t1 = p["bn1"]["beta"] - p["bn1"]["mean"] * s1

    # Fuse per-branch conv1s + channel concat into one block-structured (9, cmid, cin).
    w1_full = jnp.zeros((9, cmid, cin), jnp.float32)
    b1 = jnp.zeros((cmid,), jnp.float32)
    co = 0
    for i in range(n_branch):
        w_oihw, b = p["conv1s"][i]                               # (do, ci, 3, 3)
        ci, off, do = in_chs[i], offsets[i], out_chs[i]
        w_toi = jnp.transpose(w_oihw, (2, 3, 0, 1)).reshape(9, do, ci)   # (tap, o, i)
        w1_full = w1_full.at[:, co:co + do, off:off + ci].set(w_toi)
        b1 = b1.at[co:co + do].set(b)
        co += do

    # Fold bn2 + conv1 bias into conv1.
    s2 = p["bn2"]["gamma"] / jnp.sqrt(p["bn2"]["var"] + eps)
    t2 = p["bn2"]["beta"] - p["bn2"]["mean"] * s2
    w1p = w1_full * s2.reshape(1, cmid, 1)                        # (9, cmid, cin)
    b1p = b1 * s2 + t2                                            # (cmid,)

    # Per-tap validity masks over the flattened H*W lane axis ("same" padding).
    rows = jnp.arange(H).reshape(H, 1)
    cols = jnp.arange(W).reshape(1, W)
    masks = []
    for kh in range(3):
        for kw in range(3):
            dh, dw = kh - 1, kw - 1
            valid = ((rows + dh >= 0) & (rows + dh < H) &
                     (cols + dw >= 0) & (cols + dw < W))
            masks.append(valid.reshape(1, HW))
    mask = jnp.concatenate(masks, axis=0).astype(jnp.float32)     # (9, HW)

    # Fold bn1 fully into conv1: scale input-channel columns by s1; the shift t1
    # becomes a border-aware per-position bias map (zero padding is NOT bn-shifted).
    w1pp = w1p * s1.reshape(1, 1, cin)                            # (9, cmid, cin)
    tap_t1 = jnp.einsum('toc,c->to', w1p, t1)                     # (9, cmid)
    b1_map = b1p.reshape(cmid, 1) + jnp.einsum('to,tp->op', tap_t1, mask)  # (cmid, HW)

    # Stacked-tap weight layout: column index = t*C + c  (matches in-kernel stack).
    w1b = jnp.transpose(w1pp, (1, 0, 2)).reshape(cmid, 9 * cin).astype(jnp.bfloat16)

    w2_oihw, b2 = p["conv2"]
    w2_toi = jnp.transpose(w2_oihw, (2, 3, 0, 1)).reshape(9, cmid, cmid)  # (tap, o, i)
    w2b = jnp.transpose(w2_toi, (1, 0, 2)).reshape(cmid, 9 * cmid).astype(jnp.bfloat16)
    b2_map = jnp.broadcast_to(b2.reshape(cmid, 1), (cmid, HW)).astype(jnp.float32)

    mask_b = jnp.broadcast_to(mask.reshape(9, 1, HW), (9, cmid, HW)).astype(jnp.float32)

    return (w1b, b1_map, w2b, b2_map, mask_b)


# --------------------------------- reference ---------------------------------

def ref_forward(cfg, x_nchw, p, eps=1e-5):
    """Pure-JAX (XLA conv) mirror of InputBlock.forward, eval-mode BN, NCHW."""
    n_branch, in_chs, offsets, _out_chs = cfg[1]
    dn = ('NCHW', 'OIHW', 'NCHW')

    def bn(x, q):
        s = q["gamma"] / jnp.sqrt(q["var"] + eps)
        t = q["beta"] - q["mean"] * s
        return x * s.reshape(1, -1, 1, 1) + t.reshape(1, -1, 1, 1)

    x = bn(x_nchw, p["bn1"])
    outs = []
    for i in range(n_branch):
        w, b = p["conv1s"][i]
        xi = x[:, offsets[i]:offsets[i] + in_chs[i], :, :]
        yi = jax.lax.conv_general_dilated(xi, w, (1, 1), 'SAME', dimension_numbers=dn)
        outs.append(yi + b.reshape(1, -1, 1, 1))
    y = bn(jnp.concatenate(outs, axis=1), p["bn2"])
    w2, b2 = p["conv2"]
    z = jax.lax.conv_general_dilated(y, w2, (1, 1), 'SAME', dimension_numbers=dn)
    return jnp.maximum(z + b2.reshape(1, -1, 1, 1), 0.0)


if __name__ == "__main__":
    # cfg = [in_channels, [n_branches, in_ch_per_branch, ch_offsets, out_ch_per_branch]]
    cfg = [4, [2, [2, 3], [0, 1], [8, 8]]]      # concat channels = 16

    key = jax.random.PRNGKey(0)
    kx, kp = jax.random.split(key)
    N, H, W = 2, 16, 16
    x = jax.random.normal(kx, (N, cfg[0], H, W), jnp.float32)   # PyTorch NCHW layout

    raw_params = make_torch_like_params(cfg, kp)
    kparams = fold_params_for_kernel(cfg, raw_params, H, W)

    out = input_block_pallas(x, kparams)
    out = jax.block_until_ready(out)

    ref = ref_forward(cfg, x, raw_params)
    assert out.shape == ref.shape == (N, sum(cfg[1][3]), H, W)
    max_err = float(jnp.max(jnp.abs(out - ref)))
    # bf16 MXU operands (per perf review) => looser tolerance than the f32 kernel.
    if max_err > 5e-2:
        raise AssertionError(f"Pallas/XLA mismatch, max abs err = {max_err}")
    print("KERNEL_OK")
</pallas_src>

<mosaic_0001>
module attributes {stable_mosaic.version = 11 : i64} {
  func.func @kernel(%arg0: i32, %arg1: memref<1x4x256xf32, #tpu.memory_space<vmem>>, %arg2: memref<16x36xbf16, #tpu.memory_space<vmem>>, %arg3: memref<16x256xf32, #tpu.memory_space<vmem>>, %arg4: memref<16x144xbf16, #tpu.memory_space<vmem>>, %arg5: memref<16x256xf32, #tpu.memory_space<vmem>>, %arg6: memref<9x16x256xf32, #tpu.memory_space<vmem>>, %arg7: memref<1x16x256xf32, #tpu.memory_space<vmem>>, %arg8: memref<144x256xbf16, #tpu.memory_space<vmem>>) attributes {dimension_semantics = [#tpu.dimension_semantics<parallel>], iteration_bounds = array<i64: 2>, scalar_prefetch = 0 : i64, scratch_operands = 1 : i64, tpu.core_type = #tpu.core_type<tc>, window_params = [{transform_indices = @transform_0, window_bounds = array<i64: 1, 4, 256>}, {pipeline_mode = #tpu.pipeline_mode<synchronous>, transform_indices = @transform_1, window_bounds = array<i64: 16, 36>}, {pipeline_mode = #tpu.pipeline_mode<synchronous>, transform_indices = @transform_2, window_bounds = array<i64: 16, 256>}, {pipeline_mode = #tpu.pipeline_mode<synchronous>, transform_indices = @transform_3, window_bounds = array<i64: 16, 144>}, {pipeline_mode = #tpu.pipeline_mode<synchronous>, transform_indices = @transform_4, window_bounds = array<i64: 16, 256>}, {pipeline_mode = #tpu.pipeline_mode<synchronous>, transform_indices = @transform_5, window_bounds = array<i64: 9, 16, 256>}, {transform_indices = @transform_6, window_bounds = array<i64: 1, 16, 256>}]} {
    %c0 = arith.constant 0 : index
    %c0_0 = arith.constant 0 : index
    %c0_1 = arith.constant 0 : index
    %0 = vector.load %arg1[%c0, %c0_0, %c0_1] : memref<1x4x256xf32, #tpu.memory_space<vmem>>, vector<1x4x256xf32>
    %1 = vector.shape_cast %0 : vector<1x4x256xf32> to vector<4x256xf32>
    %c17_i32 = arith.constant 17 : i32
    %2 = tpu.dynamic_rotate %1 by %c17_i32 dim 1 : vector<4x256xf32>, i32 -> vector<4x256xf32>
    %c0_2 = arith.constant 0 : index
    %c0_3 = arith.constant 0 : index
    %c0_4 = arith.constant 0 : index
    %3 = vector.load %arg6[%c0_2, %c0_3, %c0_4] : memref<9x16x256xf32, #tpu.memory_space<vmem>>, vector<1x4x256xf32>
    %4 = vector.shape_cast %3 : vector<1x4x256xf32> to vector<4x256xf32>
    %5 = arith.mulf %2, %4 : vector<4x256xf32>
    %c16_i32 = arith.constant 16 : i32
    %6 = tpu.dynamic_rotate %1 by %c16_i32 dim 1 : vector<4x256xf32>, i32 -> vector<4x256xf32>
    %c1 = arith.constant 1 : index
    %c0_5 = arith.constant 0 : index
    %c0_6 = arith.constant 0 : index
    %7 = vector.load %arg6[%c1, %c0_5, %c0_6] : memref<9x16x256xf32, #tpu.memory_space<vmem>>, vector<1x4x256xf32>
    %8 = vector.shape_cast %7 : vector<1x4x256xf32> to vector<4x256xf32>
    %9 = arith.mulf %6, %8 : vector<4x256xf32>
    %c15_i32 = arith.constant 15 : i32
    %10 = tpu.dynamic_rotate %1 by %c15_i32 dim 1 : vector<4x256xf32>, i32 -> vector<4x256xf32>
    %c2 = arith.constant 2 : index
    %c0_7 = arith.constant 0 : index
    %c0_8 = arith.constant 0 : index
    %11 = vector.load %arg6[%c2, %c0_7, %c0_8] : memref<9x16x256xf32, #tpu.memory_space<vmem>>, vector<1x4x256xf32>
    %12 = vector.shape_cast %11 : vector<1x4x256xf32> to vector<4x256xf32>
    %13 = arith.mulf %10, %12 : vector<4x256xf32>
    %c1_i32 = arith.constant 1 : i32
    %14 = tpu.dynamic_rotate %1 by %c1_i32 dim 1 : vector<4x256xf32>, i32 -> vector<4x256xf32>
    %c3 = arith.constant 3 : index
    %c0_9 = arith.constant 0 : index
    %c0_10 = arith.constant 0 : index
    %15 = vector.load %arg6[%c3, %c0_9, %c0_10] : memref<9x16x256xf32, #tpu.memory_space<vmem>>, vector<1x4x256xf32>
    %16 = vector.shape_cast %15 : vector<1x4x256xf32> to vector<4x256xf32>
    %17 = arith.mulf %14, %16 : vector<4x256xf32>
    %c255_i32 = arith.constant 255 : i32
    %18 = tpu.dynamic_rotate %1 by %c255_i32 dim 1 : vector<4x256xf32>, i32 -> vector<4x256xf32>
    %c5 = arith.constant 5 : index
    %c0_11 = arith.constant 0 : index
    %c0_12 = arith.constant 0 : index
    %19 = vector.load %arg6[%c5, %c0_11, %c0_12] : memref<9x16x256xf32, #tpu.memory_space<vmem>>, vector<1x4x256xf32>
    %20 = vector.shape_cast %19 : vector<1x4x256xf32> to vector<4x256xf32>
    %21 = arith.mulf %18, %20 : vector<4x256xf32>
    %c241_i32 = arith.constant 241 : i32
    %22 = tpu.dynamic_rotate %1 by %c241_i32 dim 1 : vector<4x256xf32>, i32 -> vector<4x256xf32>
    %c6 = arith.constant 6 : index
    %c0_13 = arith.constant 0 : index
    %c0_14 = arith.constant 0 : index
    %23 = vector.load %arg6[%c6, %c0_13, %c0_14] : memref<9x16x256xf32, #tpu.memory_space<vmem>>, vector<1x4x256xf32>
    %24 = vector.shape_cast %23 : vector<1x4x256xf32> to vector<4x256xf32>
    %25 = arith.mulf %22, %24 : vector<4x256xf32>
    %c240_i32 = arith.constant 240 : i32
    %26 = tpu.dynamic_rotate %1 by %c240_i32 dim 1 : vector<4x256xf32>, i32 -> vector<4x256xf32>
    %c7 = arith.constant 7 : index
    %c0_15 = arith.constant 0 : index
    %c0_16 = arith.constant 0 : index
    %27 = vector.load %arg6[%c7, %c0_15, %c0_16] : memref<9x16x256xf32, #tpu.memory_space<vmem>>, vector<1x4x256xf32>
    %28 = vector.shape_cast %27 : vector<1x4x256xf32> to vector<4x256xf32>
    %29 = arith.mulf %26, %28 : vector<4x256xf32>
    %c239_i32 = arith.constant 239 : i32
    %30 = tpu.dynamic_rotate %1 by %c239_i32 dim 1 : vector<4x256xf32>, i32 -> vector<4x256xf32>
    %c8 = arith.constant 8 : index
    %c0_17 = arith.constant 0 : index
    %c0_18 = arith.constant 0 : index
    %31 = vector.load %arg6[%c8, %c0_17, %c0_18] : memref<9x16x256xf32, #tpu.memory_space<vmem>>, vector<1x4x256xf32>
    %32 = vector.shape_cast %31 : vector<1x4x256xf32> to vector<4x256xf32>
    %33 = arith.mulf %30, %32 : vector<4x256xf32>
    %34 = tpu.concatenate %5, %9, %13, %17, %1, %21, %25, %29, %33 in 0 : vector<4x256xf32>, vector<4x256xf32>, vector<4x256xf32>, vector<4x256xf32>, vector<4x256xf32>, vector<4x256xf32>, vector<4x256xf32>, vector<4x256xf32>, vector<4x256xf32> -> vector<36x256xf32>
    %35 = arith.truncf %34 : vector<36x256xf32> to vector<36x256xbf16>
    %c0_19 = arith.constant 0 : index
    %c0_20 = arith.constant 0 : index
    %36 = vector.load %arg2[%c0_19, %c0_20] : memref<16x36xbf16, #tpu.memory_space<vmem>>, vector<16x36xbf16>
    %cst = arith.constant dense<0.000000e+00> : vector<16x256xf32>
    %37 = tpu.matmul %36, %35, %cst {dimension_numbers = #tpu.dot_dimension_numbers<[1], [0], [0], [1], [0, 0, 1, 1], [], []>} : vector<16x36xbf16>, vector<36x256xbf16>, vector<16x256xf32> -> vector<16x256xf32>
    %c0_21 = arith.constant 0 : index
    %c0_22 = arith.constant 0 : index
    %38 = vector.load %arg3[%c0_21, %c0_22] : memref<16x256xf32, #tpu.memory_space<vmem>>, vector<16x256xf32>
    %39 = arith.addf %37, %38 : vector<16x256xf32>
    %c17_i32_23 = arith.constant 17 : i32
    %40 = tpu.dynamic_rotate %39 by %c17_i32_23 dim 1 : vector<16x256xf32>, i32 -> vector<16x256xf32>
    %c0_24 = arith.constant 0 : index
    %c0_25 = arith.constant 0 : index
    %c0_26 = arith.constant 0 : index
    %41 = vector.load %arg6[%c0_24, %c0_25, %c0_26] : memref<9x16x256xf32, #tpu.memory_space<vmem>>, vector<1x16x256xf32>
    %42 = vector.shape_cast %41 : vector<1x16x256xf32> to vector<16x256xf32>
    %43 = arith.mulf %40, %42 : vector<16x256xf32>
    %44 = arith.truncf %43 : vector<16x256xf32> to vector<16x256xbf16>
    %c0_27 = arith.constant 0 : index
    %c0_28 = arith.constant 0 : index
    %45 = vector.load %arg8[%c0_27, %c0_28] : memref<144x256xbf16, #tpu.memory_space<vmem>>, vector<16x256xbf16>
    tpu.vector_store %arg8[%c0_27, %c0_28], %44 {strides = array<i32>} : memref<144x256xbf16, #tpu.memory_space<vmem>>, vector<16x256xbf16>,
    %c16_i32_29 = arith.constant 16 : i32
    %46 = tpu.dynamic_rotate %39 by %c16_i32_29 dim 1 : vector<16x256xf32>, i32 -> vector<16x256xf32>
    %c1_30 = arith.constant 1 : index
    %c0_31 = arith.constant 0 : index
    %c0_32 = arith.constant 0 : index
    %47 = vector.load %arg6[%c1_30, %c0_31, %c0_32] : memref<9x16x256xf32, #tpu.memory_space<vmem>>, vector<1x16x256xf32>
    %48 = vector.shape_cast %47 : vector<1x16x256xf32> to vector<16x256xf32>
    %49 = arith.mulf %46, %48 : vector<16x256xf32>
    %50 = arith.truncf %49 : vector<16x256xf32> to vector<16x256xbf16>
    %c16 = arith.constant 16 : index
    %c0_33 = arith.constant 0 : index
    %51 = vector.load %arg8[%c16, %c0_33] : memref<144x256xbf16, #tpu.memory_space<vmem>>, vector<16x256xbf16>
    tpu.vector_store %arg8[%c16, %c0_33], %50 {strides = array<i32>} : memref<144x256xbf16, #tpu.memory_space<vmem>>, vector<16x256xbf16>,
    %c15_i32_34 = arith.constant 15 : i32
    %52 = tpu.dynamic_rotate %39 by %c15_i32_34 dim 1 : vector<16x256xf32>, i32 -> vector<16x256xf32>
    %c2_35 = arith.constant 2 : index
    %c0_36 = arith.constant 0 : index
    %c0_37 = arith.constant 0 : index
    %53 = vector.load %arg6[%c2_35, %c0_36, %c0_37] : memref<9x16x256xf32, #tpu.memory_space<vmem>>, vector<1x16x256xf32>
    %54 = vector.shape_cast %53 : vector<1x16x256xf32> to vector<16x256xf32>
    %55 = arith.mulf %52, %54 : vector<16x256xf32>
    %56 = arith.truncf %55 : vector<16x256xf32> to vector<16x256xbf16>
    %c32 = arith.constant 32 : index
    %c0_38 = arith.constant 0 : index
    %57 = vector.load %arg8[%c32, %c0_38] : memref<144x256xbf16, #tpu.memory_space<vmem>>, vector<16x256xbf16>
    tpu.vector_store %arg8[%c32, %c0_38], %56 {strides = array<i32>} : memref<144x256xbf16, #tpu.memory_space<vmem>>, vector<16x256xbf16>,
    %c1_i32_39 = arith.constant 1 : i32
    %58 = tpu.dynamic_rotate %39 by %c1_i32_39 dim 1 : vector<16x256xf32>, i32 -> vector<16x256xf32>
    %c3_40 = arith.constant 3 : index
    %c0_41 = arith.constant 0 : index
    %c0_42 = arith.constant 0 : index
    %59 = vector.load %arg6[%c3_40, %c0_41, %c0_42] : memref<9x16x256xf32, #tpu.memory_space<vmem>>, vector<1x16x256xf32>
    %60 = vector.shape_cast %59 : vector<1x16x256xf32> to vector<16x256xf32>
    %61 = arith.mulf %58, %60 : vector<16x256xf32>
    %62 = arith.truncf %61 : vector<16x256xf32> to vector<16x256xbf16>
    %c48 = arith.constant 48 : index
    %c0_43 = arith.constant 0 : index
    %63 = vector.load %arg8[%c48, %c0_43] : memref<144x256xbf16, #tpu.memory_space<vmem>>, vector<16x256xbf16>
    tpu.vector_store %arg8[%c48, %c0_43], %62 {strides = array<i32>} : memref<144x256xbf16, #tpu.memory_space<vmem>>, vector<16x256xbf16>,
    %64 = arith.truncf %39 : vector<16x256xf32> to vector<16x256xbf16>
    %c64 = arith.constant 64 : index
    %c0_44 = arith.constant 0 : index
    %65 = vector.load %arg8[%c64, %c0_44] : memref<144x256xbf16, #tpu.memory_space<vmem>>, vector<16x256xbf16>
    tpu.vector_store %arg8[%c64, %c0_44], %64 {strides = array<i32>} : memref<144x256xbf16, #tpu.memory_space<vmem>>, vector<16x256xbf16>,
    %c255_i32_45 = arith.constant 255 : i32
    %66 = tpu.dynamic_rotate %39 by %c255_i32_45 dim 1 : vector<16x256xf32>, i32 -> vector<16x256xf32>
    %c5_46 = arith.constant 5 : index
    %c0_47 = arith.constant 0 : index
    %c0_48 = arith.constant 0 : index
    %67 = vector.load %arg6[%c5_46, %c0_47, %c0_48] : memref<9x16x256xf32, #tpu.memory_space<vmem>>, vector<1x16x256xf32>
    %68 = vector.shape_cast %67 : vector<1x16x256xf32> to vector<16x256xf32>
    %69 = arith.mulf %66, %68 : vector<16x256xf32>
    %70 = arith.truncf %69 : vector<16x256xf32> to vector<16x256xbf16>
    %c80 = arith.constant 80 : index
    %c0_49 = arith.constant 0 : index
    %71 = vector.load %arg8[%c80, %c0_49] : memref<144x256xbf16, #tpu.memory_space<vmem>>, vector<16x256xbf16>
    tpu.vector_store %arg8[%c80, %c0_49], %70 {strides = array<i32>} : memref<144x256xbf16, #tpu.memory_space<vmem>>, vector<16x256xbf16>,
    %c241_i32_50 = arith.constant 241 : i32
    %72 = tpu.dynamic_rotate %39 by %c241_i32_50 dim 1 : vector<16x256xf32>, i32 -> vector<16x256xf32>
    %c6_51 = arith.constant 6 : index
    %c0_52 = arith.constant 0 : index
    %c0_53 = arith.constant 0 : index
    %73 = vector.load %arg6[%c6_51, %c0_52, %c0_53] : memref<9x16x256xf32, #tpu.memory_space<vmem>>, vector<1x16x256xf32>
    %74 = vector.shape_cast %73 : vector<1x16x256xf32> to vector<16x256xf32>
    %75 = arith.mulf %72, %74 : vector<16x256xf32>
    %76 = arith.truncf %75 : vector<16x256xf32> to vector<16x256xbf16>
    %c96 = arith.constant 96 : index
    %c0_54 = arith.constant 0 : index
    %77 = vector.load %arg8[%c96, %c0_54] : memref<144x256xbf16, #tpu.memory_space<vmem>>, vector<16x256xbf16>
    tpu.vector_store %arg8[%c96, %c0_54], %76 {strides = array<i32>} : memref<144x256xbf16, #tpu.memory_space<vmem>>, vector<16x256xbf16>,
    %c240_i32_55 = arith.constant 240 : i32
    %78 = tpu.dynamic_rotate %39 by %c240_i32_55 dim 1 : vector<16x256xf32>, i32 -> vector<16x256xf32>
    %c7_56 = arith.constant 7 : index
    %c0_57 = arith.constant 0 : index
    %c0_58 = arith.constant 0 : index
    %79 = vector.load %arg6[%c7_56, %c0_57, %c0_58] : memref<9x16x256xf32, #tpu.memory_space<vmem>>, vector<1x16x256xf32>
    %80 = vector.shape_cast %79 : vector<1x16x256xf32> to vector<16x256xf32>
    %81 = arith.mulf %78, %80 : vector<16x256xf32>
    %82 = arith.truncf %81 : vector<16x256xf32> to vector<16x256xbf16>
    %c112 = arith.constant 112 : index
    %c0_59 = arith.constant 0 : index
    %83 = vector.load %arg8[%c112, %c0_59] : memref<144x256xbf16, #tpu.memory_space<vmem>>, vector<16x256xbf16>
    tpu.vector_store %arg8[%c112, %c0_59], %82 {strides = array<i32>} : memref<144x256xbf16, #tpu.memory_space<vmem>>, vector<16x256xbf16>,
    %c239_i32_60 = arith.constant 239 : i32
    %84 = tpu.dynamic_rotate %39 by %c239_i32_60 dim 1 : vector<16x256xf32>, i32 -> vector<16x256xf32>
    %c8_61 = arith.constant 8 : index
    %c0_62 = arith.constant 0 : index
    %c0_63 = arith.constant 0 : index
    %85 = vector.load %arg6[%c8_61, %c0_62, %c0_63] : memref<9x16x256xf32, #tpu.memory_space<vmem>>, vector<1x16x256xf32>
    %86 = vector.shape_cast %85 : vector<1x16x256xf32> to vector<16x256xf32>
    %87 = arith.mulf %84, %86 : vector<16x256xf32>
    %88 = arith.truncf %87 : vector<16x256xf32> to vector<16x256xbf16>
    %c128 = arith.constant 128 : index
    %c0_64 = arith.constant 0 : index
    %89 = vector.load %arg8[%c128, %c0_64] : memref<144x256xbf16, #tpu.memory_space<vmem>>, vector<16x256xbf16>
    tpu.vector_store %arg8[%c128, %c0_64], %88 {strides = array<i32>} : memref<144x256xbf16, #tpu.memory_space<vmem>>, vector<16x256xbf16>,
    %c0_65 = arith.constant 0 : index
    %c0_66 = arith.constant 0 : index
    %90 = vector.load %arg4[%c0_65, %c0_66] : memref<16x144xbf16, #tpu.memory_space<vmem>>, vector<16x144xbf16>
    %c0_67 = arith.constant 0 : index
    %c0_68 = arith.constant 0 : index
    %91 = vector.load %arg8[%c0_67, %c0_68] : memref<144x256xbf16, #tpu.memory_space<vmem>>, vector<144x256xbf16>
    %cst_69 = arith.constant dense<0.000000e+00> : vector<16x256xf32>
    %92 = tpu.matmul %90, %91, %cst_69 {dimension_numbers = #tpu.dot_dimension_numbers<[1], [0], [0], [1], [0, 0, 1, 1], [], []>} : vector<16x144xbf16>, vector<144x256xbf16>, vector<16x256xf32> -> vector<16x256xf32>
    %c0_70 = arith.constant 0 : index
    %c0_71 = arith.constant 0 : index
    %93 = vector.load %arg5[%c0_70, %c0_71] : memref<16x256xf32, #tpu.memory_space<vmem>>, vector<16x256xf32>
    %94 = arith.addf %92, %93 : vector<16x256xf32>
    %cst_72 = arith.constant 0.000000e+00 : f32
    %95 = vector.broadcast %cst_72 : f32 to vector<16x256xf32>
    %96 = arith.maximumf %94, %95 : vector<16x256xf32>
    %c0_73 = arith.constant 0 : index
    %c0_74 = arith.constant 0 : index
    %c0_75 = arith.constant 0 : index
    %97 = vector.load %arg7[%c0_73, %c0_74, %c0_75] : memref<1x16x256xf32, #tpu.memory_space<vmem>>, vector<1x16x256xf32>
    %98 = vector.shape_cast %97 : vector<1x16x256xf32> to vector<16x256xf32>
    %99 = vector.shape_cast %96 : vector<16x256xf32> to vector<1x16x256xf32>
    tpu.vector_store %arg7[%c0_73, %c0_74, %c0_75], %99 {strides = array<i32>} : memref<1x16x256xf32, #tpu.memory_space<vmem>>, vector<1x16x256xf32>,
    return
  }
  func.func @transform_0(%arg0: i32) -> (i32, i32, i32) {
    %c0_i32 = arith.constant 0 : i32
    %c0_i32_0 = arith.constant 0 : i32
    %c0_i32_1 = arith.constant 0 : i32
    return %arg0, %c0_i32, %c0_i32_0 : i32, i32, i32
  }
  func.func @transform_1(%arg0: i32) -> (i32, i32) {
    %c0_i32 = arith.constant 0 : i32
    %c0_i32_0 = arith.constant 0 : i32
    %c0_i32_1 = arith.constant 0 : i32
    return %c0_i32, %c0_i32_0 : i32, i32
  }
  func.func @transform_2(%arg0: i32) -> (i32, i32) {
    %c0_i32 = arith.constant 0 : i32
    %c0_i32_0 = arith.constant 0 : i32
    %c0_i32_1 = arith.constant 0 : i32
    return %c0_i32, %c0_i32_0 : i32, i32
  }
  func.func @transform_3(%arg0: i32) -> (i32, i32) {
    %c0_i32 = arith.constant 0 : i32
    %c0_i32_0 = arith.constant 0 : i32
    %c0_i32_1 = arith.constant 0 : i32
    return %c0_i32, %c0_i32_0 : i32, i32
  }
  func.func @transform_4(%arg0: i32) -> (i32, i32) {
    %c0_i32 = arith.constant 0 : i32
    %c0_i32_0 = arith.constant 0 : i32
    %c0_i32_1 = arith.constant 0 : i32
    return %c0_i32, %c0_i32_0 : i32, i32
  }
  func.func @transform_5(%arg0: i32) -> (i32, i32, i32) {
    %c0_i32 = arith.constant 0 : i32
    %c0_i32_0 = arith.constant 0 : i32
    %c0_i32_1 = arith.constant 0 : i32
    %c0_i32_2 = arith.constant 0 : i32
    return %c0_i32, %c0_i32_0, %c0_i32_1 : i32, i32, i32
  }
  func.func @transform_6(%arg0: i32) -> (i32, i32, i32) {
    %c0_i32 = arith.constant 0 : i32
    %c0_i32_0 = arith.constant 0 : i32
    %c0_i32_1 = arith.constant 0 : i32
    return %arg0, %c0_i32, %c0_i32_0 : i32, i32, i32
  }
}

</mosaic_0001>

<bundles_post_ra>
// kernel: tpu_custom_call.1
= control target key start
LH: loop header
LB: loop body
LE: loop exit
PB: predicated region body
PF: predicated region fallthrough
CT: control target
= control target key end

     0   :  { %11 = vsyncpa [#allocation4], 0  ;;  %s2001_s0 = inlined_call_operand.hbm [shape: f32[2,4,256], index: 0, kind: input, shape index: {}]   ;;  %s2002_s1 = inlined_call_operand.hbm [shape: bf16[16,36], index: 1, kind: input, shape index: {}]   ;;  %s2003_s2 = inlined_call_operand.hbm [shape: f32[16,256], index: 2, kind: input, shape index: {}]   ;;  %s2004_s3 = inlined_call_operand.hbm [shape: bf16[16,144], index: 3, kind: input, shape index: {}]   ;;  %s2005_s4 = inlined_call_operand.hbm [shape: f32[16,256], index: 4, kind: input, shape index: {}]   ;;  %s2006_s5 = inlined_call_operand.hbm [shape: f32[9,16,256], index: 5, kind: input, shape index: {}]   ;;  %s2007_s6 = inlined_call_operand.hbm [shape: f32[2,16,256], index: 6, kind: output, shape index: {}]  }
   0x1   :  { %13 = vsyncpa [#allocation4 + $0x1], 0 }
   0x2   :  { %14 = vsyncpa [#allocation7], 0 }
   0x3   :  { %15 = vsyncpa [#allocation10], 0 }
   0x4   :  { %16 = vsyncpa [#allocation13], 0 }
   0x5   :  { %17 = vsyncpa [#allocation5], 0 }
   0x6   :  { %19 = vsyncpa [#allocation5 + $0x1], 0  ;;  %s1424_s21 = smov 0   ;;  %s1426_s22 = smov 0  }
   0x7   :  { %s1428_s23 = smov 0   ;;  %s1430_s24 = smov 0  }
   0x8 LB: > { %s1366_s25 = smov [#allocation6]   ;;  %s1445_s27 = sadd.s32 4294967295, %s1364_s24   ;;  %s1364_s24 = sphi %s1430_s24, %s2032_s24   ;;  %s1360_s23 = sphi %s1428_s23, %s2031_s23   ;;  %s1356_s22 = sphi %s1426_s22, %s2030_s22   ;;  %s1352_s21 = sphi %s1424_s21, %s2029_s21  }
   0x9   : > { %s199_s26 = sshll.u32 %s1366_s25, 4  ;;  %p967_p0 = scmp.ge.s32.totalorder %s1364_s24, 1  ;;  %s1450_s26 = int_to_ptr.vmem [resolvable:$true] %s199_s26 }
   0xa   : > { %p2008_p1 = scmp.eq.s32.totalorder %s1445_s27, 0  ;;  %p187_p2 = scmp.lt.s32.totalorder %s1364_s24, 3 }
   0xb   : > { %s1367_s29 = smov [#allocation9]   ;;  %s1368_s8 = smov [#allocation8]  }
   0xc   : > { %p1452_p3 = pnand %p967_p0, %p187_p2  ;;  %s225_s30 = sshll.u32 %s1367_s29, 4  ;;  %s1465_s30 = int_to_ptr.vmem [resolvable:$true] %s225_s30 }
   0xd   : > { %s1467_s9 = sshll.u32 %s1368_s8, 4  ;;  %s1116_s12 = scalar_lea.hbm %s2002_s1, 128  ;;  %s213_s9 = int_to_ptr.vmem [resolvable:$true] %s1467_s9 }
   0xe   : > { %s2011_s28 = scalar_select %p1452_p3, 1, 0 }
   0xf   : > { %p1022_p5 = pneg %p1452_p3  ;;  %p1117_p7 = scmp.ne.s32.totalorder %s2002_s1, %s1116_s12 }
  0x10   : > { %p1123_p11 = scmp.lt.u32.totalorder %s1116_s12, %s2002_s1 }
  0x11   : > { %p1461_p6 = pnand %p1022_p5, %p2008_p1 }
  0x13   : > { %p1477_p8 = pneg %p1461_p6 }
  0x15   : > { %p1119_p9 = pnand %p1477_p8, %p1117_p7 }
  0x17   : > { %p1120_p10 = pneg %p1119_p9 }
  0x19   : > { %p1125_p12 = pnand %p1123_p11, %p1120_p10 }
  0x1b   : > { %1128 = shalt.err (!%p1125_p12)
}
  0x1c   : > { %s1129_s18 = scalar_lea.vmem %s1450_s26, 128  ;;  %p1137_p5 = scmp.lt.s32.totalorder %s1450_s26, %s1450_s26 }
  0x1d   : > { %p1130_p13 = scmp.ne.s32.totalorder %s1450_s26, %s1129_s18  ;;  %p1138_p4 = scmp.lt.s32.totalorder %s1129_s18, %s1129_s18 }
  0x1f   : > { %p1132_p0 = pnand %p1130_p13, %p1477_p8  ;;  %p1139_p7 = por %p1138_p4, %p1137_p5 }
  0x21   : > { %p1133_p2 = pneg %p1132_p0 }
  0x23   : > { %p1140_p9 = pnand %p1139_p7, %p1133_p2 }
  0x25   : > { %1143 = shalt.err (!%p1140_p9)
}
  0x26   : > { %s1369_s19 = smov 64   ;;  %s1370_s20 = smov 4  }
  0x27   : > { %1025 = dma.hbm_to_vmem [thread:$0]  (!%p1461_p6), %s2002_s1, 128, %s1450_s26, [#allocation7], %s1369_s19, %s1369_s19, %s1370_s20  }
  0x28   : > { %s1144_s11 = scalar_lea.hbm %s2004_s3, 256 }
  0x29   : > { %p1145_p4 = scmp.ne.s32.totalorder %s2004_s3, %s1144_s11  ;;  %p1151_p12 = scmp.lt.u32.totalorder %s1144_s11, %s2004_s3 }
  0x2b   : > { %p1147_p10 = pnand %p1145_p4, %p1477_p8 }
  0x2d   : > { %p1148_p11 = pneg %p1147_p10 }
  0x2f   : > { %p1153_p13 = pnand %p1151_p12, %p1148_p11 }
  0x31   : > { %1156 = shalt.err (!%p1153_p13)
}
  0x32   : > { %s1157_s26 = scalar_lea.vmem %s1465_s30, 256  ;;  %p1165_p7 = scmp.lt.s32.totalorder %s1465_s30, %s1465_s30 }
  0x33   : > { %p1158_p0 = scmp.ne.s32.totalorder %s1465_s30, %s1157_s26  ;;  %p1166_p9 = scmp.lt.s32.totalorder %s1157_s26, %s1157_s26 }
  0x35   : > { %p1160_p2 = pnand %p1158_p0, %p1477_p8  ;;  %p1167_p4 = por %p1166_p9, %p1165_p7 }
  0x37   : > { %p1161_p5 = pneg %p1160_p2 }
  0x39   : > { %p1168_p10 = pnand %p1167_p4, %p1161_p5 }
  0x3b   : > { %1171 = shalt.err (!%p1168_p10)
}
  0x3c   : > { %s1371_s17 = smov 128   ;;  %s1372_s18 = smov 8  }
  0x3d   : > { %1031 = dma.hbm_to_vmem [thread:$0]  (!%p1461_p6), %s2004_s3, 256, %s1465_s30, [#allocation10], %s1371_s17, %s1371_s17, %s1372_s18  }
  0x3e   : > { %s1172_s8 = scalar_lea.hbm %s2003_s2, 512 }
  0x3f   : > { %p1173_p11 = scmp.ne.s32.totalorder %s2003_s2, %s1172_s8  ;;  %p1179_p0 = scmp.lt.u32.totalorder %s1172_s8, %s2003_s2 }
  0x41   : > { %p1175_p12 = pnand %p1173_p11, %p1477_p8 }
  0x43   : > { %p1176_p13 = pneg %p1175_p12 }
  0x45   : > { %p1181_p2 = pnand %p1179_p0, %p1176_p13 }
  0x47   : > { %1184 = shalt.err (!%p1181_p2)
}
  0x48   : > { %s1185_s14 = scalar_lea.vmem %s213_s9, 512  ;;  %p1193_p4 = scmp.lt.s32.totalorder %s213_s9, %s213_s9 }
  0x49   : > { %p1186_p5 = scmp.ne.s32.totalorder %s213_s9, %s1185_s14  ;;  %p1194_p10 = scmp.lt.s32.totalorder %s1185_s14, %s1185_s14 }
  0x4b   : > { %p1188_p7 = pnand %p1186_p5, %p1477_p8  ;;  %p1195_p1 = por %p1194_p10, %p1193_p4 }
  0x4d   : > { %p1189_p9 = pneg %p1188_p7 }
  0x4f   : > { %p1196_p3 = pnand %p1195_p1, %p1189_p9 }
  0x51   : > { %1199 = shalt.err (!%p1196_p3)
}
  0x52   : > { %s1373_s30 = smov 256   ;;  %s1374_s16 = smov 16  }
  0x53   : > { %1028 = dma.hbm_to_vmem [thread:$0]  (!%p1461_p6), %s2003_s2, 512, %s213_s9, [#allocation7], %s1373_s30, %s1373_s30, %s1374_s16  }
  0x54   : > { %s1375_s18 = smov [#allocation11]   ;;  %s1376_s20 = smov [#allocation12]  }
  0x55   : > { %s238_s19 = sshll.u32 %s1375_s18, 4  ;;  %s251_s25 = sshll.u32 %s1376_s20, 4  ;;  %s239_s19 = int_to_ptr.vmem [resolvable:$true] %s238_s19  ;;  %s252_s25 = int_to_ptr.vmem [resolvable:$true] %s251_s25 }
  0x56   : > { %s1200_s10 = scalar_lea.hbm %s2005_s4, 512 }
  0x57   : > { %p1201_p1 = scmp.ne.s32.totalorder %s2005_s4, %s1200_s10  ;;  %p1207_p12 = scmp.lt.u32.totalorder %s1200_s10, %s2005_s4 }
  0x59   : > { %p1203_p3 = pnand %p1201_p1, %p1477_p8 }
  0x5b   : > { %p1204_p11 = pneg %p1203_p3 }
  0x5d   : > { %p1209_p13 = pnand %p1207_p12, %p1204_p11 }
  0x5f   : > { %1212 = shalt.err (!%p1209_p13)
}
  0x60   : > { %s1213_s9 = scalar_lea.vmem %s239_s19, 512  ;;  %p1221_p7 = scmp.lt.s32.totalorder %s239_s19, %s239_s19 }
  0x61   : > { %p1214_p0 = scmp.ne.s32.totalorder %s239_s19, %s1213_s9  ;;  %p1222_p9 = scmp.lt.s32.totalorder %s1213_s9, %s1213_s9 }
  0x63   : > { %p1216_p2 = pnand %p1214_p0, %p1477_p8  ;;  %p1223_p4 = por %p1222_p9, %p1221_p7 }
  0x65   : > { %p1217_p5 = pneg %p1216_p2 }
  0x67   : > { %p1224_p10 = pnand %p1223_p4, %p1217_p5 }
  0x69   : > { %1227 = shalt.err (!%p1224_p10)
}
  0x6a   : > { %1034 = dma.hbm_to_vmem [thread:$0]  (!%p1461_p6), %s2005_s4, 512, %s239_s19, [#allocation10], %s1373_s30, %s1373_s30, %s1374_s16  }
  0x6b   : > { %s1228_s29 = scalar_lea.hbm %s2006_s5, 4608 }
  0x6c   : > { %p1229_p1 = scmp.ne.s32.totalorder %s2006_s5, %s1228_s29  ;;  %p1235_p12 = scmp.lt.u32.totalorder %s1228_s29, %s2006_s5 }
  0x6e   : > { %p1231_p3 = pnand %p1229_p1, %p1477_p8 }
  0x70   : > { %p1232_p11 = pneg %p1231_p3 }
  0x72   : > { %p1237_p13 = pnand %p1235_p12, %p1232_p11 }
  0x74   : > { %1240 = shalt.err (!%p1237_p13)
}
  0x75   : > { %s1241_s13 = scalar_lea.vmem %s252_s25, 4608  ;;  %p1249_p7 = scmp.lt.s32.totalorder %s252_s25, %s252_s25 }
  0x76   : > { %p1242_p0 = scmp.ne.s32.totalorder %s252_s25, %s1241_s13  ;;  %p1250_p9 = scmp.lt.s32.totalorder %s1241_s13, %s1241_s13 }
  0x78   : > { %p1244_p2 = pnand %p1242_p0, %p1477_p8  ;;  %p1251_p4 = por %p1250_p9, %p1249_p7 }
  0x7a   : > { %p1245_p5 = pneg %p1244_p2 }
  0x7c   : > { %p1252_p10 = pnand %p1251_p4, %p1245_p5 }
  0x7e   : > { %1255 = shalt.err (!%p1252_p10)
}
  0x7f   : > { %1037 = dma.hbm_to_vmem [thread:$0]  (!%p1461_p6), %s2006_s5, 4608, %s252_s25, [#allocation13], %s1373_s30, %s1373_s30, %s1374_s16  }
  0x80   : > { %s966_s7 = sadd.s32 4294967294, %s1364_s24   ;;  %s1587_s15 = sadd.s32 1, %s1364_s24  }
  0x81   : > { %s32_s9 = sadd.s32 1, %s1360_s23  ;;  %s29_s26 = ssub.s32 %s1364_s24, %s1587_s15 }
  0x82   : > { %p39_p8 = scmp.ne.s32.totalorder %s1360_s23, %s1356_s22  ;;  %p30_p1 = scmp.eq.s32.totalorder %s29_s26, 0 }
  0x83   : > { %p40_p3 = scmp.eq.s32.totalorder %s1364_s24, 0  ;;  %p45_p11 = scmp.ne.s32.totalorder %s1356_s22, %s1352_s21 }
  0x84   : > { %p174_p12 = scmp.eq.s32.totalorder %s1445_s27, 1  ;;  %p2014_p0 = scmp.eq.s32.totalorder %s1445_s27, 0 }
  0x85   : > { %s1599_s17 = scalar_select %p30_p1, %s1360_s23, %s32_s9  }
  0x86   : > { %p41_p13 = por %p40_p3, %p39_p8  ;;  %p1603_p2 = por %p2014_p0, %p45_p11 }
  0x87   : > { %p1607_p6 = por %p174_p12, %p39_p8  ;;  %p180_p5 = scmp.eq.s32.totalorder %s966_s7, 1 }
  0x88   : > { %p1051_p7 = scmp.lt.s32.totalorder %s1364_s24, 2  ;;  %s265_s16 = sand.u32 1, %s1360_s23  }
  0x89   : > { %s2016_s30 = scalar_select %p1607_p6, 1, 0 }
  0x8a   : > { %p1613_p9 = por %p180_p5, %p45_p11  ;;  %s974_s20 = sshll.u32 %s265_s16, 3 }
  0x8b   : > { %s996_s29 = sshll.u32 %s1364_s24, 7  ;;  %s269_s12 = scalar_lea.vmem [#allocation3], %s974_s20 }
  0x8c   : > { %s2017_s25 = scalar_select %p1613_p9, 1, 0 }
  0x8d   : > { %s1621_s11 = scalar_lea.hbm %s2001_s0, %s996_s29  ;;  %s277_s13 = sshll.u32 %s269_s12, 4  ;;  %s1627_s13 = int_to_ptr.vmem [resolvable:$true] %s277_s13 }
  0x8e   : > { %p1623_p4 = pnand %p1051_p7, %p41_p13  ;;  %s266_s14 = scalar_lea.sflag [#allocation4], %s265_s16 }
  0x8f   : > { %s1256_s7 = scalar_lea.hbm %s1621_s11, 128  ;;  %s1261_s20 = scalar_lea.hbm %s2001_s0, 256 }
  0x90   : > { %p1257_p10 = scmp.ne.s32.totalorder %s1621_s11, %s1256_s7  ;;  %p1258_p8 = pneg %p1623_p4 }
  0x91   : > { %p1262_p11 = scmp.lt.u32.totalorder %s1621_s11, %s2001_s0  ;;  %p1263_p12 = scmp.lt.u32.totalorder %s1261_s20, %s1256_s7 }
  0x92   : > { %p1259_p1 = pnand %p1258_p8, %p1257_p10  ;;  %p1265_p0 = scmp.lt.u32.totalorder %s1256_s7, %s1621_s11 }
  0x93   : > { %p1264_p13 = por %p1263_p12, %p1262_p11 }
  0x94   : > { %p1260_p3 = pneg %p1259_p1 }
  0x95   : > { %p1266_p5 = por %p1265_p0, %p1264_p13 }
  0x97   : > { %p1267_p7 = pnand %p1266_p5, %p1260_p3 }
  0x99   : > { %1270 = shalt.err (!%p1267_p7)
}
  0x9a   : > { %s1271_s16 = scalar_lea.vmem %s1627_s13, 128  ;;  %s1377_s10 = smov [#allocation3]  }
  0x9b   : > { %p1272_p10 = scmp.ne.s32.totalorder %s1627_s13, %s1271_s16  ;;  %s1276_s12 = sshll.u32 %s1377_s10, 4  ;;  %s1277_s12 = int_to_ptr.vmem [resolvable:$false] %s1276_s12 }
  0x9c   : > { %s1278_s9 = scalar_lea.vmem %s1277_s12, 256  ;;  %p1279_p6 = scmp.lt.s32.totalorder %s1627_s13, %s1277_s12 }
  0x9d   : > { %p1274_p1 = pnand %p1272_p10, %p1258_p8  ;;  %p1280_p11 = scmp.lt.s32.totalorder %s1278_s9, %s1271_s16 }
  0x9f   : > { %p1275_p9 = pneg %p1274_p1  ;;  %p1281_p12 = por %p1280_p11, %p1279_p6 }
  0xa1   : > { %p1282_p13 = pnand %p1281_p12, %p1275_p9 }
  0xa3   : > { %1285 = shalt.err (!%p1282_p13)
}
  0xa4   : > { %1041 = dma.hbm_to_vmem [thread:$0]  (!%p1623_p4), %s1621_s11, 128, %s1627_s13, %s266_s14  }
  0xa5   : > { %p2019_p3 = scmp.ne.s32.totalorder %s2011_s28, 0 }
  0xa6   : > { %s1657_s7 = sand.u32 (!%p2019_p3), 1, %s1356_s22  }
  0xa7   : > { %286 = sbr.rel (%p2019_p3) target bundleno = 972 (0x3cc), region = 44  ;;  %s978_s26 = sshll.u32 (!%p2019_p3), %s1657_s7, 3 }
  0xa8   : > { %s289_s20 = scalar_lea.sflag (!%p2019_p3), [#allocation4], %s1657_s7  ;;  %s292_s29 = scalar_lea.vmem (!%p2019_p3), [#allocation3], %s978_s26 }
  0xae   : > { %1331 = dma.done.wait (%p1603_p2), %s289_s20, 128  }
  0xaf   : > { %1333 = vsyncadd (%p1603_p2), %s289_s20, 4294967168  ;;  %p2020_p6 = scmp.eq.s32.totalorder %s1445_s27, 0 }
  0xb1   : > { %1335 = dma.done.wait (%p2020_p6), [#allocation7], 640   ;;  %p2021_p9 = pmov %p2020_p6 }
  0xb2   : > { %p2022_p4 = pmov %p2020_p6 }
  0xb3   : > { %1337 = vsyncadd (%p2021_p9), [#allocation7], 4294966656 }
  0xb4   : > { %1339 = dma.done.wait (%p2022_p4), [#allocation10], 768   ;;  %p2023_p8 = pmov %p2022_p4 }
  0xb5   : > { %p2024_p0 = pmov %p2022_p4 }
  0xb6   : > { %1341 = vsyncadd (%p2023_p8), [#allocation10], 4294966528 }
  0xb7   : > { %1343 = dma.done.wait (%p2024_p0), [#allocation13], 4608   ;;  %p2025_p5 = pmov %p2024_p0 }
  0xb8   : > { %v1677_v0 = vld [vmem:[%s292_s29] sm:$0xff]  ;;  %s1378_s28 = smov 1   ;;  %s1379_s18 = smov 16   ;;  %v1384_v2 = vmov 0   ;;  %v350_v3 = vlaneseq  ;;  %v392_v10 = vld [vmem:[#allocation12 + $0x68] sm:$0xf] }
  0xb9   : > { %1345 = vsyncadd (%p2025_p5), [#allocation13], 4294962688  ;;  %383 = vrot.lane.b32.xlu1 %v1677_v0, %s1378_s28  ;;  %359 = vrot.lane.b32.xlu0 %v1677_v0, %s1379_s18  ;;  %v1685_v1 = vcombine.high %v1677_v0, %v1677_v0  ;;  %s1380_s11 = smov 17   ;;  %s1381_s13 = smov 15   ;;  %v391_v9 = vld [vmem:[#allocation12 + $0x60] sm:$0xf] }
  0xba   : > { %s1382_s19 = smov 127   ;;  %s1383_s14 = smov 112   ;;  %536 = vmatprep.mubr.bf16.mxu0 %v1384_v2  ;;  %v1715_v4 = vand.u32 127, %v350_v3  ;;  %v367_v13 = vld [vmem:[#allocation12 + $0x20] sm:$0xf]  ;;  %vm467_vm5 = vcmask 1043456  }
  0xbb   : > { %s1385_s8 = smov 113   ;;  %s1386_s16 = smov 111   ;;  %v368_v14 = vld [vmem:[#allocation12 + $0x28] sm:$0xf]  ;;  %v355_v21 = vld [vmem:[#allocation12] sm:$0xf] }
  0xbc   : > { %vm387_vm0 = vcmp.lt.s32.totalorder %v1715_v4, 1  ;;  %vm363_vm1 = vcmp.lt.s32.totalorder %v1715_v4, 16  ;;  %vm352_vm2 = vcmp.lt.s32.totalorder %v1715_v4, 17  ;;  %vm375_vm3 = vcmp.lt.s32.totalorder %v1715_v4, 15  ;;  %v356_v24 = vld [vmem:[#allocation12 + $0x8] sm:$0xf] }
  0xbd   : > { %346 = vrot.lane.b32.xlu0 %v1677_v0, %s1380_s11  ;;  %385 = vrot.lane.b32.xlu1 %v1685_v1, %s1378_s28  ;;  %v379_v27 = vld [vmem:[#allocation12 + $0x40] sm:$0xf]  ;;  %v380_v28 = vld [vmem:[#allocation12 + $0x48] sm:$0xf]  ;;  %vm399_vm4 = vcmp.lt.s32.totalorder %v1715_v4, 127  ;;  %vm423_vm6 = vcmp.lt.s32.totalorder %v1715_v4, 112 }
  0xbe   : > { %v403_v47 = vld [vmem:[#allocation12 + $0xa0] sm:$0xf]  ;;  %v404_v48 = vld [vmem:[#allocation12 + $0xa8] sm:$0xf]  ;;  %vm411_vm7 = vcmp.lt.s32.totalorder %v1715_v4, 113  ;;  %vm435_vm8 = vcmp.lt.s32.totalorder %v1715_v4, 111 }
  0xbf   : > { %v427_v53 = vld [vmem:[#allocation12 + $0xe0] sm:$0xf]  ;;  %v428_v54 = vld [vmem:[#allocation12 + $0xe8] sm:$0xf]  ;;  %vm497_vm9 = vcmask 1041408   ;;  %vm493_vm10 = vcmask 293888  }
  0xc0   : > { %v415_v63 = vld [vmem:[#allocation12 + $0xc0] sm:$0xf]  ;;  %v416_v2 = vld [vmem:[#allocation12 + $0xc8] sm:$0xf]  ;;  %vm776_vm11 = vcmask 130048   ;;  %s984_s10 = sshll.u32 %s1657_s7, 5 }
  0xc1   : > { %348 = vrot.lane.b32.xlu1 %v1685_v1, %s1380_s11  ;;  %361 = vrot.lane.b32.xlu0 %v1685_v1, %s1379_s18  ;;  %s340_s12 = scalar_lea.vmem [#allocation14], %s984_s10  ;;  %s997_s26 = sshll.u32 %s1445_s27, 9 }
  0xc2   : > { %s845_s9 = sshll.u32 %s340_s12, 4  ;;  %p2026_p7 = scmp.ne.s32.totalorder %s2016_s30, 0  ;;  %s1951_s9 = int_to_ptr.vmem [resolvable:$true] %s845_s9 }
  0xc3   : > { %s1286_s27 = scalar_lea.vmem %s1951_s9, 512 }
  0xc4   : > { %p1287_p2 = scmp.ne.s32.totalorder %s1951_s9, %s1286_s27 }
  0xc5   : > { %373 = vrot.lane.b32.xlu1 %v1685_v1, %s1381_s13  ;;  %371 = vrot.lane.b32.xlu0 %v1677_v0, %s1381_s13 }
  0xc6   : > { %p1288_p10 = pnand %p1287_p2, %p2026_p7 }
  0xc8   : > { %p1289_p1 = pneg %p1288_p10 }
  0xc9   : > { %397 = vrot.lane.b32.xlu1 %v1685_v1, %s1382_s19  ;;  %395 = vrot.lane.b32.xlu0 %v1677_v0, %s1382_s19 }
  0xcd   : > { %421 = vrot.lane.b32.xlu1 %v1685_v1, %s1383_s14  ;;  %419 = vrot.lane.b32.xlu0 %v1677_v0, %s1383_s14 }
  0xd1   : > { %409 = vrot.lane.b32.xlu1 %v1685_v1, %s1385_s8  ;;  %407 = vrot.lane.b32.xlu0 %v1677_v0, %s1385_s8 }
  0xd5   : > { %433 = vrot.lane.b32.xlu1 %v1685_v1, %s1386_s16  ;;  %431 = vrot.lane.b32.xlu0 %v1677_v0, %s1386_s16 }
 0x12b   : > { %v384_v5 = vpop.permute.xlu1 %383  ;;  %v360_v6 = vpop.permute.xlu0 %359 }
 0x12f   : > { %v347_v7 = vpop.permute.xlu0 %346  ;;  %v386_v8 = vpop.permute.xlu1 %385 }
 0x130   : > { %v388_v11 = vsel %vm387_vm0, %v384_v5, %v386_v8  ;;  %v389_v12 = vsel %vm387_vm0, %v386_v8, %v384_v5 }
 0x131   : > { %v393_v17 = vmul.f32 %v391_v9, %v389_v12  ;;  %v394_v18 = vmul.f32 %v392_v10, %v388_v11 }
 0x133   : > { %v349_v15 = vpop.permute.xlu1 %348  ;;  %v362_v16 = vpop.permute.xlu0 %361  ;;  %v451_v33 = vrot.slane %v393_v17, 4  ;;  %v452_v34 = vrot.slane %v394_v18, 4 }
 0x134   : > { %v364_v19 = vsel %vm363_vm1, %v360_v6, %v362_v16  ;;  %v365_v20 = vsel %vm363_vm1, %v362_v16, %v360_v6  ;;  %v353_v25 = vsel %vm352_vm2, %v347_v7, %v349_v15  ;;  %v354_v26 = vsel %vm352_vm2, %v349_v15, %v347_v7  ;;  %v440_v15 = vld [vmem:[#allocation12 + $0x108] sm:$0xf] }
 0x135   : > { %v369_v22 = vmul.f32 %v367_v13, %v365_v20  ;;  %v370_v23 = vmul.f32 %v368_v14, %v364_v19  ;;  %v357_v37 = vmul.f32 %v355_v21, %v354_v26  ;;  %v358_v38 = vmul.f32 %v356_v24, %v353_v25  ;;  %v439_v14 = vld [vmem:[#allocation12 + $0x100] sm:$0xf] }
 0x137   : > { %v445_v29 = vrot.slane %v369_v22, 4  ;;  %v446_v30 = vrot.slane %v370_v23, 4  ;;  %v374_v31 = vpop.permute.xlu1 %373  ;;  %v372_v32 = vpop.permute.xlu0 %371 }
 0x138   : > { %v376_v35 = vsel %vm375_vm3, %v372_v32, %v374_v31  ;;  %v377_v36 = vsel %vm375_vm3, %v374_v31, %v372_v32  ;;  %v486_v32 = vld [vmem:[#allocation8 + $0x10] sm:$0xff] }
 0x139   : > { %v381_v39 = vmul.f32 %v379_v27, %v377_v36  ;;  %v382_v40 = vmul.f32 %v380_v28, %v376_v35  ;;  %v469_v43 = vsel %vm467_vm5, %v358_v38, %v446_v30  ;;  %v468_v45 = vsel %vm467_vm5, %v357_v37, %v445_v29  ;;  %v484_v30 = vld [vmem:[#allocation8] sm:$0xff]  ;;  %v487_v36 = vld [vmem:[#allocation8 + $0x18] sm:$0xff] }
 0x13b   : > { %v398_v41 = vpop.permute.xlu1 %397  ;;  %v396_v42 = vpop.permute.xlu0 %395  ;;  %v471_v44 = vsel %vm467_vm5, %v382_v40, %v452_v34  ;;  %v470_v46 = vsel %vm467_vm5, %v381_v39, %v451_v33  ;;  %v485_v34 = vld [vmem:[#allocation8 + $0x8] sm:$0xff] }
 0x13c   : > { %v400_v49 = vsel %vm399_vm4, %v396_v42, %v398_v41  ;;  %v401_v50 = vsel %vm399_vm4, %v398_v41, %v396_v42  ;;  %v477_v51 = vpack.c.bf16 %v471_v44, %v469_v43  ;;  %v476_v52 = vpack.c.bf16 %v470_v46, %v468_v45  ;;  %v1115_v44 = vld [vmem:[#allocation9 + $0x4] ss:$8 sps:$4 sm:$0xff]  }
 0x13d   : > { %v405_v55 = vmul.f32 %v403_v47, %v400_v49  ;;  %v406_v56 = vmul.f32 %v404_v48, %v401_v50  ;;  %990 = vmatprep.mubr.msk.bf16.mxu1 %vm776_vm11, %v1115_v44 }
 0x13e   : > { %504 = vmatprep.subr.bf16.mxu0 %v477_v51 }
 0x13f   : > { %v422_v57 = vpop.permute.xlu1 %421  ;;  %505 = vmatpush1.bf16.msra.mxu0 %v476_v52  ;;  %v420_v58 = vpop.permute.xlu0 %419  ;;  %v457_v3 = vrot.slane %v405_v55, 4  ;;  %v458_v5 = vrot.slane %v406_v56, 4 }
 0x140   : > { %v424_v59 = vsel %vm423_vm6, %v420_v58, %v422_v57  ;;  %v425_v60 = vsel %vm423_vm6, %v422_v57, %v420_v58 }
 0x141   : > { %v429_v61 = vmul.f32 %v427_v53, %v424_v59  ;;  %v430_v62 = vmul.f32 %v428_v54, %v425_v60  ;;  %v473_v18 = vsel %vm467_vm5, %v1685_v1, %v458_v5  ;;  %v472_v20 = vsel %vm467_vm5, %v1677_v0, %v457_v3  ;;  %v1112_v0 = vld [vmem:[#allocation6] sm:$0xff]   ;;  %v559_v59 = vld [vmem:[#allocation12] sm:$0xff]  ;;  %v562_v3 = vld [vmem:[#allocation12 + $0x18] sm:$0xff] }
 0x143   : > { %v410_v6 = vpop.permute.xlu1 %409  ;;  %v408_v7 = vpop.permute.xlu0 %407  ;;  %v463_v10 = vrot.slane %v429_v61, 4  ;;  %v464_v11 = vrot.slane %v430_v62, 4 }
 0x144   : > { %v412_v8 = vsel %vm411_vm7, %v408_v7, %v410_v6  ;;  %v413_v9 = vsel %vm411_vm7, %v410_v6, %v408_v7 }
 0x145   : > { %v417_v12 = vmul.f32 %v415_v63, %v412_v8  ;;  %v418_v13 = vmul.f32 %v416_v2, %v413_v9  ;;  %v561_v63 = vld [vmem:[#allocation12 + $0x10] sm:$0xff]  ;;  %v560_v2 = vld [vmem:[#allocation12 + $0x8] sm:$0xff] }
 0x147   : > { %v434_v16 = vpop.permute.xlu1 %433  ;;  %v432_v17 = vpop.permute.xlu0 %431  ;;  %v475_v19 = vsel %vm467_vm5, %v418_v13, %v464_v11  ;;  %v474_v21 = vsel %vm467_vm5, %v417_v12, %v463_v10  ;;  %v583_v10 = vld [vmem:[#allocation12 + $0x20] sm:$0xff] }
 0x148   : > { %v436_v22 = vsel %vm435_vm8, %v432_v17, %v434_v16  ;;  %v437_v23 = vsel %vm435_vm8, %v434_v16, %v432_v17  ;;  %v479_v24 = vpack.c.bf16 %v475_v19, %v473_v18  ;;  %v478_v25 = vpack.c.bf16 %v474_v21, %v472_v20  ;;  %v585_v17 = vld [vmem:[#allocation12 + $0x30] sm:$0xff]  ;;  %v586_v18 = vld [vmem:[#allocation12 + $0x38] sm:$0xff] }
 0x149   : > { %v441_v26 = vmul.f32 %v439_v14, %v436_v22  ;;  %v442_v27 = vmul.f32 %v440_v15, %v437_v23  ;;  %v584_v14 = vld [vmem:[#allocation12 + $0x28] sm:$0xff] }
 0x14a   : > { %506 = vmatprep.subr.bf16.mxu0 %v479_v24 }
 0x14b   : > { %v480_v1 = vpack.c.bf16 %v441_v26, %v441_v26  ;;  %v481_v28 = vpack.c.bf16 %v442_v27, %v442_v27  ;;  %507 = vmatpush1.bf16.msra.mxu0 %v478_v25 }
 0x14d   : > { %986 = vmatprep.subr.msk.bf16.mxu0 %vm497_vm9, %v481_v28  ;;  %v499_v29 = vsel %vm497_vm9, %v480_v1, 0  ;;  %v607_v1 = vld [vmem:[#allocation12 + $0x40] sm:$0xff] }
 0x14f   : > { %509 = vmatpush1.bf16.msra.mxu0 %v499_v29  ;;  %v608_v29 = vld [vmem:[#allocation12 + $0x48] sm:$0xff] }
 0x152   : > { %987 = vmatmul.mubr.msk.bf16.vlgmr.msra.gmra.mrb[0].mxu0 %vm493_vm10, %v1112_v0 }
 0x225   : > { %v538_v31 = vpop.f32.mrb[0].mxu0 }
 0x226   : > { %v1767_v33 = vadd.f32 %v538_v31, %v484_v30  ;;  %v540_v35 = vpop.f32.mrb[1].mxu0  ;;  %v609_v31 = vld [vmem:[#allocation12 + $0x50] sm:$0xff] }
 0x227   : > { %v542_v37 = vpop.f32.mrb[2].mxu0  ;;  %v1773_v40 = vadd.f32 %v540_v35, %v485_v34 }
 0x228   : > { %v1769_v38 = vadd.f32 %v542_v37, %v486_v32  ;;  %v544_v39 = vpop.f32.mrb[3].mxu0  ;;  %547 = vrot.lane.b32.xlu0 %v1767_v33, %s1380_s11  ;;  %v610_v32 = vld [vmem:[#allocation12 + $0x58] sm:$0xff] }
 0x229   : > { %v1775_v41 = vadd.f32 %v544_v39, %v487_v36 }
 0x22a   : > { %549 = vrot.lane.b32.xlu1 %v1769_v38, %s1380_s11  ;;  %v643_v42 = vpack.c.bf16 %v1769_v38, %v1767_v33 }
 0x22b   : > { %v644_v43 = vpack.c.bf16 %v1775_v41, %v1773_v40 }
 0x22c   : > { %571 = vrot.lane.b32.xlu0 %v1767_v33, %s1379_s18 }
 0x22e   : > { %573 = vrot.lane.b32.xlu1 %v1769_v38, %s1379_s18 }
 0x230   : > { %595 = vrot.lane.b32.xlu0 %v1767_v33, %s1381_s13 }
 0x232   : > { %597 = vrot.lane.b32.xlu1 %v1769_v38, %s1381_s13 }
 0x234   : > { %619 = vrot.lane.b32.xlu0 %v1767_v33, %s1378_s28 }
 0x236   : > { %621 = vrot.lane.b32.xlu1 %v1769_v38, %s1378_s28 }
 0x238   : > { %647 = vrot.lane.b32.xlu0 %v1767_v33, %s1382_s19 }
 0x23a   : > { %649 = vrot.lane.b32.xlu1 %v1769_v38, %s1382_s19 }
 0x23c   : > { %671 = vrot.lane.b32.xlu0 %v1767_v33, %s1385_s8 }
 0x23e   : > { %673 = vrot.lane.b32.xlu1 %v1769_v38, %s1385_s8 }
 0x240   : > { %695 = vrot.lane.b32.xlu0 %v1767_v33, %s1383_s14 }
 0x242   : > { %697 = vrot.lane.b32.xlu1 %v1769_v38, %s1383_s14 }
 0x244   : > { %551 = vrot.lane.b32.xlu0 %v1773_v40, %s1380_s11 }
 0x246   : > { %553 = vrot.lane.b32.xlu1 %v1775_v41, %s1380_s11  ;;  %s832_s11 = scalar_lea.sflag [#allocation5], %s1657_s7 }
 0x248   : > { %575 = vrot.lane.b32.xlu0 %v1773_v40, %s1379_s18 }
 0x24a   : > { %577 = vrot.lane.b32.xlu1 %v1775_v41, %s1379_s18 }
 0x24c   : > { %599 = vrot.lane.b32.xlu0 %v1773_v40, %s1381_s13 }
 0x24e   : > { %601 = vrot.lane.b32.xlu1 %v1775_v41, %s1381_s13  ;;  %s1387_s13 = smov [#allocation14]  }
 0x250   : > { %623 = vrot.lane.b32.xlu0 %v1773_v40, %s1378_s28 }
 0x252   : > { %625 = vrot.lane.b32.xlu1 %v1775_v41, %s1378_s28  ;;  %s1956_s28 = scalar_lea.hbm %s2007_s6, %s997_s26 }
 0x254   : > { %719 = vrot.lane.b32.xlu0 %v1767_v33, %s1386_s16 }
 0x256   : > { %721 = vrot.lane.b32.xlu1 %v1769_v38, %s1386_s16  ;;  %v708_v38 = vld [vmem:[#allocation12 + $0xe8] sm:$0xff] }
 0x258   : > { %651 = vrot.lane.b32.xlu0 %v1773_v40, %s1382_s19 }
 0x25a   : > { %653 = vrot.lane.b32.xlu1 %v1775_v41, %s1382_s19  ;;  %s1290_s19 = sshll.u32 %s1387_s13, 4  ;;  %s1291_s19 = int_to_ptr.vmem [resolvable:$false] %s1290_s19 }
 0x25b   : > { %p1293_p11 = scmp.lt.s32.totalorder %s1951_s9, %s1291_s19 }
 0x25c   : > { %675 = vrot.lane.b32.xlu0 %v1773_v40, %s1385_s8 }
 0x25e   : > { %677 = vrot.lane.b32.xlu1 %v1775_v41, %s1385_s8 }
 0x260   : > { %699 = vrot.lane.b32.xlu0 %v1773_v40, %s1383_s14 }
 0x262   : > { %701 = vrot.lane.b32.xlu1 %v1775_v41, %s1383_s14  ;;  %s1292_s14 = scalar_lea.vmem %s1291_s19, 1024 }
 0x263   : > { %p1294_p12 = scmp.lt.s32.totalorder %s1292_s14, %s1286_s27 }
 0x264   : > { %723 = vrot.lane.b32.xlu0 %v1773_v40, %s1386_s16 }
 0x265   : > { %p1295_p13 = por %p1294_p12, %p1293_p11 }
 0x266   : > { %725 = vrot.lane.b32.xlu1 %v1775_v41, %s1386_s16 }
 0x267   : > { %p1296_p3 = pnand %p1295_p13, %p1289_p1 }
 0x29a   : > { %v548_v45 = vpop.permute.xlu0 %547 }
 0x29c   : > { %v550_v46 = vpop.permute.xlu1 %549 }
 0x29e   : > { %v572_v47 = vpop.permute.xlu0 %571 }
 0x2a0   : > { %v574_v48 = vpop.permute.xlu1 %573 }
 0x2a2   : > { %v596_v49 = vpop.permute.xlu0 %595 }
 0x2a4   : > { %v598_v50 = vpop.permute.xlu1 %597 }
 0x2a6   : > { %v620_v51 = vpop.permute.xlu0 %619 }
 0x2a8   : > { %v1843_v52 = vpop.permute.xlu1 %621 }
 0x2aa   : > { %v1845_v53 = vpop.permute.xlu0 %647 }
 0x2ac   : > { %v1847_v54 = vpop.permute.xlu1 %649 }
 0x2ae   : > { %v1849_v55 = vpop.permute.xlu0 %671 }
 0x2b0   : > { %v1851_v56 = vpop.permute.xlu1 %673 }
 0x2b2   : > { %v1853_v57 = vpop.permute.xlu0 %695 }
 0x2b4   : > { %v1855_v58 = vpop.permute.xlu1 %697 }
 0x2b6   : > { %v552_v60 = vpop.permute.xlu0 %551 }
 0x2b7   : > { %v555_v61 = vsel %vm352_vm2, %v548_v45, %v552_v60  ;;  %v557_v62 = vsel %vm352_vm2, %v552_v60, %v548_v45 }
 0x2b8   : > { %v554_v5 = vpop.permute.xlu1 %553  ;;  %v563_v8 = vmul.f32 %v559_v59, %v557_v62  ;;  %v564_v12 = vmul.f32 %v560_v2, %v555_v61  ;;  %v633_v62 = vld [vmem:[#allocation12 + $0x70] sm:$0xff] }
 0x2b9   : > { %v556_v6 = vsel %vm352_vm2, %v550_v46, %v554_v5  ;;  %v558_v7 = vsel %vm352_vm2, %v554_v5, %v550_v46 }
 0x2ba   : > { %v565_v9 = vmul.f32 %v561_v63, %v558_v7  ;;  %v576_v11 = vpop.permute.xlu0 %575  ;;  %v566_v13 = vmul.f32 %v562_v3, %v556_v6  ;;  %v634_v63 = vld [vmem:[#allocation12 + $0x78] sm:$0xff] }
 0x2bb   : > { %v579_v15 = vsel %vm363_vm1, %v572_v47, %v576_v11  ;;  %v581_v16 = vsel %vm363_vm1, %v576_v11, %v572_v47 }
 0x2bc   : > { %v578_v19 = vpop.permute.xlu1 %577  ;;  %v568_v20 = vpack.c.bf16 %v566_v13, %v564_v12  ;;  %v567_v21 = vpack.c.bf16 %v565_v9, %v563_v8  ;;  %v587_v24 = vmul.f32 %v583_v10, %v581_v16  ;;  %v588_v25 = vmul.f32 %v584_v14, %v579_v15  ;;  %v659_v14 = vld [vmem:[#allocation12 + $0xa0] sm:$0xff]  ;;  %v660_v16 = vld [vmem:[#allocation12 + $0xa8] sm:$0xff] }
 0x2bd   : > { %v580_v22 = vsel %vm363_vm1, %v574_v48, %v578_v19  ;;  %v582_v23 = vsel %vm363_vm1, %v578_v19, %v574_v48  ;;  %v631_v48 = vld [vmem:[#allocation12 + $0x60] sm:$0xff]  ;;  %v662_v19 = vld [vmem:[#allocation12 + $0xb8] sm:$0xff] }
 0x2be   : > { %v589_v26 = vmul.f32 %v585_v17, %v582_v23  ;;  %v590_v27 = vmul.f32 %v586_v18, %v580_v22  ;;  %780 = vmatprep.subr.bf16.mxu1 %v568_v20  ;;  %v600_v28 = vpop.permute.xlu0 %599  ;;  %v661_v18 = vld [vmem:[#allocation12 + $0xb0] sm:$0xff] }
 0x2bf   : > { %v603_v0 = vsel %vm375_vm3, %v596_v49, %v600_v28  ;;  %v605_v30 = vsel %vm375_vm3, %v600_v28, %v596_v49  ;;  %781 = vmatpush1.bf16.msra.mxu1 %v567_v21  ;;  %v632_v49 = vld [vmem:[#allocation12 + $0x68] sm:$0xff] }
 0x2c0   : > { %v602_v34 = vpop.permute.xlu1 %601  ;;  %v592_v35 = vpack.c.bf16 %v590_v27, %v588_v25  ;;  %v591_v36 = vpack.c.bf16 %v589_v26, %v587_v24  ;;  %v611_v44 = vmul.f32 %v607_v1, %v605_v30  ;;  %v612_v45 = vmul.f32 %v608_v29, %v603_v0  ;;  %v683_v26 = vld [vmem:[#allocation12 + $0xc0] sm:$0xff]  ;;  %v684_v1 = vld [vmem:[#allocation12 + $0xc8] sm:$0xff] }
 0x2c1   : > { %v604_v37 = vsel %vm375_vm3, %v598_v50, %v602_v34  ;;  %v606_v39 = vsel %vm375_vm3, %v602_v34, %v598_v50 }
 0x2c2   : > { %v613_v46 = vmul.f32 %v609_v31, %v606_v39  ;;  %v614_v47 = vmul.f32 %v610_v32, %v604_v37  ;;  %782 = vmatprep.subr.bf16.mxu1 %v592_v35  ;;  %v624_v59 = vpop.permute.xlu0 %623  ;;  %v709_v39 = vld [vmem:[#allocation12 + $0xf0] sm:$0xff] }
 0x2c3   : > { %v627_v60 = vsel %vm387_vm0, %v620_v51, %v624_v59  ;;  %v629_v61 = vsel %vm387_vm0, %v624_v59, %v620_v51  ;;  %783 = vmatpush1.bf16.msra.mxu1 %v591_v36  ;;  %v707_v36 = vld [vmem:[#allocation12 + $0xe0] sm:$0xff] }
 0x2c4   : > { %v626_v2 = vpop.permute.xlu1 %625  ;;  %v616_v3 = vpack.c.bf16 %v614_v47, %v612_v45  ;;  %v615_v50 = vpack.c.bf16 %v613_v46, %v611_v44  ;;  %v635_v7 = vmul.f32 %v631_v48, %v629_v61  ;;  %v636_v8 = vmul.f32 %v632_v49, %v627_v60  ;;  %v710_v44 = vld [vmem:[#allocation12 + $0xf8] sm:$0xff] }
 0x2c5   : > { %v628_v5 = vsel %vm387_vm0, %v1843_v52, %v626_v2  ;;  %v630_v6 = vsel %vm387_vm0, %v626_v2, %v1843_v52 }
 0x2c6   : > { %v637_v9 = vmul.f32 %v633_v62, %v630_v6  ;;  %v638_v10 = vmul.f32 %v634_v63, %v628_v5  ;;  %784 = vmatprep.subr.bf16.mxu1 %v616_v3  ;;  %v1891_v51 = vpop.permute.xlu0 %719  ;;  %v731_v62 = vld [vmem:[#allocation12 + $0x100] sm:$0xff]  ;;  %v732_v63 = vld [vmem:[#allocation12 + $0x108] sm:$0xff]  ;;  %v734_v5 = vld [vmem:[#allocation12 + $0x118] sm:$0xff] }
 0x2c7   : > { %785 = vmatpush1.bf16.msra.mxu1 %v615_v50  ;;  %v733_v50 = vld [vmem:[#allocation12 + $0x110] sm:$0xff] }
 0x2c8   : > { %v1893_v11 = vpop.permute.xlu1 %721  ;;  %v640_v12 = vpack.c.bf16 %v638_v10, %v636_v8  ;;  %v639_v13 = vpack.c.bf16 %v637_v9, %v635_v7 }
 0x2ca   : > { %786 = vmatprep.subr.bf16.mxu1 %v640_v12  ;;  %v652_v15 = vpop.permute.xlu0 %651 }
 0x2cb   : > { %v655_v52 = vsel %vm399_vm4, %v1845_v53, %v652_v15  ;;  %v657_v17 = vsel %vm399_vm4, %v652_v15, %v1845_v53  ;;  %787 = vmatpush1.bf16.msra.mxu1 %v639_v13 }
 0x2cc   : > { %v654_v20 = vpop.permute.xlu1 %653  ;;  %788 = vmatprep.subr.bf16.mxu1 %v644_v43  ;;  %v663_v23 = vmul.f32 %v659_v14, %v655_v52  ;;  %v664_v24 = vmul.f32 %v660_v16, %v657_v17  ;;  %v685_v43 = vld [vmem:[#allocation12 + $0xd0] sm:$0xff]  ;;  %v763_v52 = vld [vmem:[#allocation11] sm:$0xff]  ;;  %v764_v17 = vld [vmem:[#allocation11 + $0x8] sm:$0xff] }
 0x2cd   : > { %v656_v21 = vsel %vm399_vm4, %v1847_v54, %v654_v20  ;;  %v658_v22 = vsel %vm399_vm4, %v654_v20, %v1847_v54  ;;  %v686_v54 = vld [vmem:[#allocation12 + $0xd8] sm:$0xff] }
 0x2ce   : > { %v665_v25 = vmul.f32 %v661_v18, %v656_v21  ;;  %v666_v53 = vmul.f32 %v662_v19, %v658_v22  ;;  %v676_v27 = vpop.permute.xlu0 %675  ;;  %v1113_v16 = vld [vmem:[#allocation9] ss:$8 sps:$4 sm:$0xff]  }
 0x2cf   : > { %v679_v40 = vsel %vm411_vm7, %v1849_v55, %v676_v27  ;;  %v681_v41 = vsel %vm411_vm7, %v676_v27, %v1849_v55  ;;  %789 = vmatpush1.bf16.msra.mxu1 %v643_v42  ;;  %v765_v19 = vld [vmem:[#allocation11 + $0x10] sm:$0xff]  ;;  %v766_v20 = vld [vmem:[#allocation11 + $0x18] sm:$0xff] }
 0x2d0   : > { %v678_v28 = vpop.permute.xlu1 %677  ;;  %v668_v29 = vpack.c.bf16 %v666_v53, %v664_v24  ;;  %v667_v0 = vpack.c.bf16 %v665_v25, %v663_v23  ;;  %v687_v32 = vmul.f32 %v683_v26, %v679_v40  ;;  %v688_v34 = vmul.f32 %v684_v1, %v681_v41 }
 0x2d1   : > { %v680_v30 = vsel %vm411_vm7, %v1851_v56, %v678_v28  ;;  %v682_v31 = vsel %vm411_vm7, %v678_v28, %v1851_v56 }
 0x2d2   : > { %v689_v55 = vmul.f32 %v685_v43, %v680_v30  ;;  %v690_v35 = vmul.f32 %v686_v54, %v682_v31  ;;  %v700_v33 = vpop.permute.xlu0 %699  ;;  %790 = vmatprep.subr.bf16.mxu1 %v668_v29 }
 0x2d3   : > { %v703_v42 = vsel %vm423_vm6, %v1853_v57, %v700_v33  ;;  %v705_v37 = vsel %vm423_vm6, %v700_v33, %v1853_v57  ;;  %791 = vmatpush1.bf16.msra.mxu1 %v667_v0 }
 0x2d4   : > { %v702_v56 = vpop.permute.xlu1 %701  ;;  %v692_v45 = vpack.c.bf16 %v690_v35, %v688_v34  ;;  %v691_v46 = vpack.c.bf16 %v689_v55, %v687_v32  ;;  %v711_v59 = vmul.f32 %v707_v36, %v703_v42  ;;  %v712_v49 = vmul.f32 %v708_v38, %v705_v37 }
 0x2d5   : > { %v704_v47 = vsel %vm423_vm6, %v1855_v58, %v702_v56  ;;  %v706_v48 = vsel %vm423_vm6, %v702_v56, %v1855_v58 }
 0x2d6   : > { %v713_v60 = vmul.f32 %v709_v39, %v704_v47  ;;  %v714_v61 = vmul.f32 %v710_v44, %v706_v48  ;;  %v724_v57 = vpop.permute.xlu0 %723  ;;  %792 = vmatprep.subr.bf16.mxu1 %v692_v45 }
 0x2d7   : > { %v727_v2 = vsel %vm435_vm8, %v1891_v51, %v724_v57  ;;  %v729_v3 = vsel %vm435_vm8, %v724_v57, %v1891_v51  ;;  %793 = vmatpush1.bf16.msra.mxu1 %v691_v46 }
 0x2d8   : > { %v726_v58 = vpop.permute.xlu1 %725  ;;  %v716_v6 = vpack.c.bf16 %v714_v61, %v712_v49  ;;  %v715_v7 = vpack.c.bf16 %v713_v60, %v711_v59  ;;  %v735_v10 = vmul.f32 %v731_v62, %v727_v2  ;;  %v736_v12 = vmul.f32 %v732_v63, %v729_v3 }
 0x2d9   : > { %v728_v8 = vsel %vm435_vm8, %v1893_v11, %v726_v58  ;;  %v730_v9 = vsel %vm435_vm8, %v726_v58, %v1893_v11 }
 0x2da   : > { %v737_v13 = vmul.f32 %v733_v50, %v728_v8  ;;  %v738_v14 = vmul.f32 %v734_v5, %v730_v9  ;;  %794 = vmatprep.subr.bf16.mxu1 %v716_v6 }
 0x2db   : > { %795 = vmatpush1.bf16.msra.mxu1 %v715_v7 }
 0x2dc   : > { %v740_v51 = vpack.c.bf16 %v738_v14, %v736_v12  ;;  %v739_v15 = vpack.c.bf16 %v737_v13, %v735_v10 }
 0x2de   : > { %796 = vmatprep.subr.bf16.mxu1 %v740_v51 }
 0x2df   : > { %797 = vmatpush1.bf16.msra.mxu1 %v739_v15 }
 0x2e2   : > { %813 = vmatmul.mubr.bf16.vlgmr.msra.gmra.mrb[0].mxu1 %v1113_v16 }
 0x3b5   : > { %v814_v18 = vpop.f32.mrb[0].mxu1 }
 0x3b6   : > { %v815_v4 = vadd.f32 %v814_v18, %v763_v52  ;;  %v816_v11 = vpop.f32.mrb[1].mxu1 }
 0x3b7   : > { %v817_v21 = vadd.f32 %v816_v11, %v764_v17  ;;  %v818_v22 = vpop.f32.mrb[2].mxu1 }
 0x3b8   : > { %v823_v23 = vmax.f32 %v815_v4, 0.0  ;;  %v819_v24 = vadd.f32 %v818_v22, %v765_v19  ;;  %v820_v25 = vpop.f32.mrb[3].mxu1 }
 0x3b9   : > { %v824_v53 = vmax.f32 %v817_v21, 0.0  ;;  %v821_v26 = vadd.f32 %v820_v25, %v766_v20 }
 0x3ba   : > { %827 = vst [vmem:[%s340_s12] sm:$0xff] %v823_v23  ;;  %v825_v27 = vmax.f32 %v819_v24, 0.0 }
 0x3bb   : > { %828 = vst [vmem:[%s340_s12 + $0x8] sm:$0xff] %v824_v53  ;;  %v826_v1 = vmax.f32 %v821_v26, 0.0 }
 0x3bc   : > { %829 = vst [vmem:[%s340_s12 + $0x10] sm:$0xff] %v825_v27 }
 0x3bd   : > { %830 = vst [vmem:[%s340_s12 + $0x18] sm:$0xff] %v826_v1 }
 0x3be   : > { %1299 = shalt.err (!%p1296_p3)
}
 0x3bf   : > { %s1300_s8 = scalar_lea.hbm %s1956_s28, 512  ;;  %s1304_s12 = scalar_lea.hbm %s2007_s6, 1024 }
 0x3c0   : > { %p1301_p6 = scmp.ne.s32.totalorder %s1956_s28, %s1300_s8  ;;  %p1305_p8 = scmp.lt.u32.totalorder %s1956_s28, %s2007_s6 }
 0x3c1   : > { %p1306_p0 = scmp.lt.u32.totalorder %s1304_s12, %s1300_s8  ;;  %p1308_p2 = scmp.lt.u32.totalorder %s1300_s8, %s1956_s28 }
 0x3c2   : > { %p1302_p9 = pnand %p1301_p6, %p2026_p7 }
 0x3c3   : > { %p1307_p5 = por %p1306_p0, %p1305_p8 }
 0x3c4   : > { %p1303_p4 = pneg %p1302_p9 }
 0x3c5   : > { %p1309_p10 = por %p1308_p2, %p1307_p5 }
 0x3c7   : > { %p1310_p1 = pnand %p1309_p10, %p1303_p4 }
 0x3c9   : > { %1313 = shalt.err (!%p1310_p1)
}
 0x3ca   : > { %s1388_s29 = smov 256  }
 0x3cb   : > { %1020 = dma.vmem_to_hbm [thread:$0]  (%p2026_p7), %s1951_s9, 512, %s1956_s28, %s832_s11, %s1388_s29, %s1388_s29, %s1379_s18  }
 0x3cc PF: > { %s860_s27 = sand.u32 1, %s1352_s21   ;;  %p2027_p11 = scmp.ne.s32.totalorder %s2017_s25, 0 }
 0x3cd   : > { %p2028_p12 = scmp.ge.s32.totalorder %s1364_s24, 2  ;;  %s861_s13 = scalar_lea.sflag [#allocation5], %s860_s27 }
 0x3cf   : > { %p1043_p13 = pnand %p2028_p12, %p2027_p11 }
 0x3d1   : > { %1347 = dma.done.wait (!%p1043_p13), %s861_s13, 512  }
 0x3d2   : > { %1349 = vsyncadd (!%p1043_p13), %s861_s13, 4294966784  ;;  %p22_p3 = scmp.ge.s32.totalorder %s1587_s15, 4   ;;  %s2029_s21 = smov %s1356_s22 }
 0x3d3   : > { %s2030_s22 = smov %s1360_s23  ;;  %s2031_s23 = smov %s1599_s17 }
 0x3d4   : > { %s2032_s24 = smov %s1587_s15  ;;  %24 = sbr.rel (!%p22_p3) target bundleno = 8 (0x8), region = 116 }
 0x3db   :  { %866 = vsyncpa [#allocation4], 1 }
 0x3dc   :  { %868 = vsyncpa [#allocation4 + $0x1], 1 }
 0x3dd   :  { %869 = vsyncpa [#allocation7], 1 }
 0x3de   :  { %870 = vsyncpa [#allocation10], 1 }
 0x3df   :  { %871 = vsyncpa [#allocation13], 1 }
 0x3e0   :  { %872 = vsyncpa [#allocation5], 1 }
 0x3e1   :  { %874 = vsyncpa [#allocation5 + $0x1], 1 }

</bundles_post_ra>
